<compile_context>
chip_gen: v7x
topology: tpu7x:2x2x1
jax: 0.10.0
libtpu: 0.0.40
codegen_flags: <defaults>
</compile_context>

<pallas_src>
import numpy as np
import jax
import jax.numpy as jnp
from jax.experimental import pallas as pl
from jax.experimental.pallas import tpu as pltpu


# ----------------------------- Pallas kernel ------------------------------ #

def _score_kernel(x_ref, a_ref, e_ref, xout_ref, score_ref):
    # x_ref:     (TR, P*Cp) -- P nodes packed per 128-lane row (lane-dense)
    # a_ref:     (P*Cp, P)  -- block-diagonal (W / C): column j sums node j's channels
    # e_ref:     (P, P*Cp)  -- block-diagonal ones: broadcasts score j over node j's lanes
    # xout_ref:  (TR, P*Cp)
    # score_ref: (TR, P)
    x = x_ref[...]
    # per-node mean(x * W, -1) as an MXU matmul (full f32 precision so the
    # elementwise reference matches to ~1e-7).
    s = jnp.dot(x, a_ref[...], preferred_element_type=jnp.float32,
                precision=jax.lax.Precision.HIGHEST)            # (TR, P)
    s = jax.nn.sigmoid(s)                                       # EUP
    # Score store stays (TR, P) (masked, narrow) on purpose: score bytes are
    # C_pad x smaller than x_out and a (TR, P)->(P, TR) in-kernel transpose is
    # a lowering risk for tiny minor dims; x_out below is the lane-dense slab.
    score_ref[...] = s.astype(score_ref.dtype)
    scale = jnp.dot(s * 2.0, e_ref[...], preferred_element_type=jnp.float32,
                    precision=jax.lax.Precision.HIGHEST)        # (TR, P*Cp), MXU broadcast
    xout_ref[...] = (x * scale).astype(xout_ref.dtype)


# ------------------------------ tiling policy ------------------------------ #

_MAX_TILE_ROWS = 2048    # 1 MiB/buffer at 128 f32 lanes; ~4 MiB double-buffered
_MIN_TILE_ROWS = 512     # amortize ~0.35 us per-grid-step overhead (v5e/v6e)
_TARGET_GRID_STEPS = 8   # >= 2 steps per TensorCore on v7x + pipelining slack


def _round_up(a, b):
    return -(-a // b) * b


def _pick_tile_rows(rows):
    """Row-tile (multiple of 8) for `rows` packed rows."""
    if rows < 16:
        return rows                                   # single tiny block
    if rows <= 2 * _MIN_TILE_ROWS:
        # Small problem: force two grid steps so both v7x TensorCores get work
        # and the prefetch/writeback pipeline has something to overlap.
        return max(8, _round_up(pl.cdiv(rows, 2), 8))
    tr = _round_up(pl.cdiv(rows, _TARGET_GRID_STEPS), 8)
    return max(_MIN_TILE_ROWS, min(_MAX_TILE_ROWS, tr))


# ------------------------------ dense wrapper ------------------------------ #

def build_score_matrices(w):
    """Block-diagonal reduction/broadcast matrices for the kernel.

    They depend only on (C, w), so they are built once in __init__ (rebuild if
    the score parameter is updated).  If 128 % C != 0, channels are padded
    (with zero weights) to the next divisor of 128 so x_out stores stay
    lane-dense."""
    C = int(w.shape[-1])
    if C <= 128:
        C_pad = int(pl.next_power_of_2(C))   # divisors of 128 are powers of two
        P = 128 // C_pad
    else:
        C_pad, P = C, 1                      # rows already >= 128 lanes wide
    w_col = jnp.zeros((C_pad, 1), jnp.float32).at[:C, 0].set(
        w.reshape(-1).astype(jnp.float32))
    a_mat = jnp.kron(jnp.eye(P, dtype=jnp.float32), w_col / float(C))      # (P*C_pad, P)
    e_mat = jnp.kron(jnp.eye(P, dtype=jnp.float32),
                     jnp.ones((1, C_pad), jnp.float32))                    # (P, P*C_pad)
    return a_mat, e_mat


@jax.jit
def _score_and_scale_impl(x, a_mat, e_mat):
    """score = sigmoid(mean(x*w, -1)); x_out = x * score * 2 (Pallas TPU)."""
    N, C = x.shape
    PC, P = a_mat.shape
    C_pad = PC // P

    # Pack P nodes per 128-lane row; pad ONLY the tail (< 8*P nodes) so the
    # packing reshape is legal and tiles are (8,128)-aligned.  The grid uses
    # pl.cdiv, so rows need not be a multiple of the tile (Pallas clips the
    # last partial block) -- no padding to the tile boundary.
    rows = _round_up(pl.cdiv(max(N, 1), P), 8)
    n_pad = rows * P
    pad_n, pad_c = n_pad - N, C_pad - C
    if pad_n or pad_c:
        x = jnp.pad(x, ((0, pad_n), (0, pad_c)))
    x_packed = x.reshape(rows, PC)            # layout-preserving, free

    tr = _pick_tile_rows(rows)
    grid = (pl.cdiv(rows, tr),)

    out_packed, score_packed = pl.pallas_call(
        _score_kernel,
        out_shape=(jax.ShapeDtypeStruct((rows, PC), x.dtype),
                   jax.ShapeDtypeStruct((rows, P), jnp.float32)),
        grid=grid,
        in_specs=[pl.BlockSpec((tr, PC), lambda i: (i, 0)),
                  pl.BlockSpec((PC, P), lambda i: (0, 0)),    # resident in VMEM
                  pl.BlockSpec((P, PC), lambda i: (0, 0))],   # resident in VMEM
        out_specs=(pl.BlockSpec((tr, PC), lambda i: (i, 0)),
                   pl.BlockSpec((tr, P), lambda i: (i, 0))),
        compiler_params=pltpu.CompilerParams(
            dimension_semantics=("parallel",),                # megacore-shardable
            vmem_limit_bytes=32 * 1024 * 1024),
    )(x_packed, a_mat, e_mat)

    # Unpack.  When N % (8*P) == 0 and C divides 128 this is copy-free
    # (reshape only); otherwise only a single tail-trim slice remains.
    x_out = out_packed.reshape(n_pad, C_pad)
    score = score_packed.reshape(n_pad, 1)
    if pad_n or pad_c:
        x_out = x_out[:N, :C]
        score = score[:N]
    return x_out, score


def score_and_scale(x, a_mat, e_mat, *, node_bucket=0):
    """Dense hot path.  `node_bucket > 0` pads N up to a multiple of
    node_bucket BEFORE the jitted implementation so workloads with varying
    graph sizes hit a bounded set of compiled shapes (compile time easily
    dominates this us-scale, memory-bound kernel otherwise)."""
    N = x.shape[0]
    if node_bucket:
        n_to = _round_up(max(N, 1), node_bucket)
        if n_to != N:
            x = jnp.pad(x, ((0, n_to - N), (0, 0)))
    x_out, score = _score_and_scale_impl(x, a_mat, e_mat)
    if x_out.shape[0] != N:
        x_out, score = x_out[:N], score[:N]
    return x_out, score


# --------------------------- host-side graph ops --------------------------- #

def _class_counts(batch):
    # Mirrors the consecutive-run counting loop from the PyTorch forward.
    num = 0
    temp = 0
    class_num = []
    for i in batch:
        if int(i) == num:
            temp += 1
        else:
            num += 1
            class_num.append(temp)
            temp = 1
    class_num.append(temp)
    return class_num


def filter_edge(x, edge_index, batch, perm):
    num_nodes = x.shape[0]
    x = x[perm]
    batch = batch[perm]
    mask = np.full((num_nodes,), -1, dtype=np.int64)
    i = np.arange(perm.shape[0], dtype=np.int64)
    mask[perm] = i
    row, col = edge_index[0], edge_index[1]
    row, col = mask[row], mask[col]
    m = (row >= 0) & (col >= 0)
    row, col = row[m], col[m]
    return x, np.stack([row, col], axis=0), batch


class GetImportantStruct:
    """JAX/Pallas port of pyg_Struct.GetImportantStruct."""

    def __init__(self, in_channels, k, key):
        self.k = k
        # glorot init for the (1, in_channels) score parameter
        stdv = float(np.sqrt(6.0 / (1 + in_channels)))
        self.ComputeScore = jax.random.uniform(
            key, (1, in_channels), jnp.float32, minval=-stdv, maxval=stdv)
        # Hoisted kernel constants (rebuild if ComputeScore changes).
        self._a_mat, self._e_mat = build_score_matrices(self.ComputeScore)

    def __call__(self, x, edge_index, edge_num, edge_inform, batch, BatchReversal):
        # ---- dense hot path on TPU (Pallas) ----
        x_out, score = score_and_scale(x, self._a_mat, self._e_mat)
        # x_out stays on device; only the tiny `score` vector is needed on the
        # host below, so the device finishes x_out while the host loops run.

        # ---- data-dependent graph surgery on host ----
        # TODO(synk): the masking/pruning below produces data-dependent output
        # shapes (no Pallas/jit equivalent); it runs on host NumPy, faithfully
        # mirroring the reference Python loops (including skipping edge index 0).
        score_np = np.asarray(score)
        edge_index_np = np.asarray(edge_index)
        edge_inform_np = np.asarray(edge_inform)
        batch_np = np.asarray(batch)
        edge_num_plus = np.array(edge_num).copy()
        BatchReversal_plus = dict(BatchReversal)

        class_num = _class_counts(batch_np)
        temp = 0
        graph_node_score = []
        # (the reference also slices x into a `graph` list, but it is unused)
        for i in class_num:
            graph_node_score.append(score_np[temp:temp + i, ])
            temp += i
        temp = 0
        edge = []
        for i in edge_num_plus:
            edge.append(edge_index_np[:, temp:temp + int(i)])
            temp += int(i)

        total_mask = np.zeros((0,), dtype=bool)
        super_edge = []
        before_edge_num = 0
        before_node_num = 0
        for _class, edge_x in enumerate(edge):
            super_edge_temp = []
            mask = np.ones((int(edge_num_plus[_class]),), dtype=bool)
            new_edge_num = int(edge_num_plus[_class])
            for num in range(graph_node_score[_class].shape[0] - 1):
                s = graph_node_score[_class][num]
                if float(s.item()) < self.k:
                    super_edge_temp.append(num)
                    for i in range(edge_x.shape[1] - 1, 0, -1):
                        if (int(edge_x[0][i]) == num + before_node_num and
                                int(edge_x[1][i]) ==
                                graph_node_score[_class].shape[0] - 1 + before_node_num):
                            mask[i] = False
                            new_edge_num -= 1
                            break
            super_edge.append(super_edge_temp)
            before_edge_num += int(edge_num_plus[_class])
            before_node_num += class_num[_class]
            total_mask = np.concatenate((total_mask, mask), axis=0)
            edge_num_plus[_class] = new_edge_num

        edge_index_puls = edge_index_np[:, total_mask]
        edge_inform_plus = edge_inform_np[total_mask, :]

        br_batch = np.asarray(BatchReversal_plus['batch'])
        br_feature = np.asarray(BatchReversal_plus['feature'])
        br_index = np.asarray(BatchReversal_plus['index'])
        br_com_num = np.asarray(BatchReversal_plus['com_num'])

        class_num = _class_counts(br_batch)
        before_node_num = 0
        mask = np.ones(br_feature.shape[0], dtype=bool)
        for _class, graph_super_edge in enumerate(super_edge):
            for i in graph_super_edge:
                i += int(br_com_num[_class]) + before_node_num
                mask[i] = False
            before_node_num += class_num[_class]
        leave_node = np.arange(br_feature.shape[0], dtype=np.int64)[mask]
        new_feat, new_index, new_batch = filter_edge(
            br_feature, br_index, br_batch, leave_node)
        BatchReversal_plus['feature'] = jnp.asarray(new_feat)
        BatchReversal_plus['index'] = jnp.asarray(new_index)
        BatchReversal_plus['batch'] = jnp.asarray(new_batch)

        return (x_out,
                jnp.asarray(edge_index_puls),
                jnp.asarray(edge_inform_plus),
                jnp.asarray(edge_num_plus),
                BatchReversal_plus)


# --------------------------------- main ------------------------------------ #

if __name__ == "__main__":
    key = jax.random.PRNGKey(0)
    k_x, k_w, k_e, k_f = jax.random.split(key, 4)

    in_channels = 32
    # 2 graphs: graph 0 has 5 nodes (supernode = node 4),
    #           graph 1 has 4 nodes (supernode = node 8).
    N = 9
    x = jax.random.normal(k_x, (N, in_channels), jnp.float32)
    batch = jnp.array([0, 0, 0, 0, 0, 1, 1, 1, 1], dtype=jnp.int32)

    # edges: node->supernode plus a few extras, grouped by graph
    edge_index = jnp.array([[0, 1, 2, 3, 0, 1, 5, 6, 7, 5],
                            [4, 4, 4, 4, 1, 2, 8, 8, 8, 6]], dtype=jnp.int32)
    edge_num = jnp.array([6, 4], dtype=jnp.int32)
    edge_inform = jax.random.normal(k_e, (10, 4), jnp.float32)

    # auxiliary "reversal" graph
    M = 13
    BatchReversal = {
        'feature': jax.random.normal(k_f, (M, 16), jnp.float32),
        'batch': jnp.array([0] * 7 + [1] * 6, dtype=jnp.int32),
        'index': jnp.array([[0, 1, 2, 3, 5, 7, 8, 9, 10, 11],
                            [1, 2, 3, 4, 6, 8, 9, 10, 11, 12]], dtype=jnp.int32),
        'com_num': jnp.array([1, 1], dtype=jnp.int32),
    }

    module = GetImportantStruct(in_channels, k=0.5, key=k_w)
    (x_out, edge_index_puls, edge_inform_plus, edge_num_plus,
     BatchReversal_plus) = module(x, edge_index, edge_num, edge_inform,
                                  batch, BatchReversal)
    jax.block_until_ready(x_out)
    jax.block_until_ready(BatchReversal_plus['feature'])

    # quick numerical sanity check vs. a pure-JAX reference of the dense path
    ref_score = jax.nn.sigmoid(jnp.mean(x * module.ComputeScore, axis=-1,
                                        keepdims=True))
    ref_xout = x * ref_score * 2.0
    np.testing.assert_allclose(np.asarray(x_out), np.asarray(ref_xout),
                               rtol=1e-5, atol=1e-5)
    print("KERNEL_OK")
</pallas_src>

<mosaic_0001>
module attributes {stable_mosaic.version = 11 : i64} {
  func.func @_score_kernel(%arg0: i32, %arg1: memref<8x128xf32, #tpu.memory_space<vmem>>, %arg2: memref<128x4xf32, #tpu.memory_space<vmem>>, %arg3: memref<4x128xf32, #tpu.memory_space<vmem>>, %arg4: memref<8x128xf32, #tpu.memory_space<vmem>>, %arg5: memref<8x4xf32, #tpu.memory_space<vmem>>) attributes {dimension_semantics = [#tpu.dimension_semantics<parallel>], iteration_bounds = array<i64: 1>, scalar_prefetch = 0 : i64, scratch_operands = 0 : i64, tpu.core_type = #tpu.core_type<tc>, window_params = [{transform_indices = @transform_0, window_bounds = array<i64: 8, 128>}, {pipeline_mode = #tpu.pipeline_mode<synchronous>, transform_indices = @transform_1, window_bounds = array<i64: 128, 4>}, {pipeline_mode = #tpu.pipeline_mode<synchronous>, transform_indices = @transform_2, window_bounds = array<i64: 4, 128>}, {transform_indices = @transform_3, window_bounds = array<i64: 8, 128>}, {transform_indices = @transform_4, window_bounds = array<i64: 8, 4>}]} {
    %c0 = arith.constant 0 : index
    %c0_0 = arith.constant 0 : index
    %0 = vector.load %arg1[%c0, %c0_0] : memref<8x128xf32, #tpu.memory_space<vmem>>, vector<8x128xf32>
    %c0_1 = arith.constant 0 : index
    %c0_2 = arith.constant 0 : index
    %1 = vector.load %arg2[%c0_1, %c0_2] : memref<128x4xf32, #tpu.memory_space<vmem>>, vector<128x4xf32>
    %cst = arith.constant dense<0.000000e+00> : vector<8x4xf32>
    %2 = tpu.matmul %0, %1, %cst {dimension_numbers = #tpu.dot_dimension_numbers<[1], [0], [0], [1], [0, 0, 1, 1], [], []>, precision = #tpu.contract_precision<fp32>} : vector<8x128xf32>, vector<128x4xf32>, vector<8x4xf32> -> vector<8x4xf32>
    %3 = arith.negf %2 : vector<8x4xf32>
    %4 = math.exp %3 : vector<8x4xf32>
    %cst_3 = arith.constant 1.000000e+00 : f32
    %5 = vector.broadcast %cst_3 : f32 to vector<8x4xf32>
    %6 = arith.addf %5, %4 : vector<8x4xf32>
    %7 = arith.divf %5, %6 : vector<8x4xf32>
    %c0_4 = arith.constant 0 : index
    %c0_5 = arith.constant 0 : index
    %8 = vector.load %arg5[%c0_4, %c0_5] : memref<8x4xf32, #tpu.memory_space<vmem>>, vector<8x4xf32>
    tpu.vector_store %arg5[%c0_4, %c0_5], %7 {strides = array<i32>} : memref<8x4xf32, #tpu.memory_space<vmem>>, vector<8x4xf32>,
    %cst_6 = arith.constant 2.000000e+00 : f32
    %9 = vector.broadcast %cst_6 : f32 to vector<8x4xf32>
    %10 = arith.mulf %7, %9 : vector<8x4xf32>
    %c0_7 = arith.constant 0 : index
    %c0_8 = arith.constant 0 : index
    %11 = vector.load %arg3[%c0_7, %c0_8] : memref<4x128xf32, #tpu.memory_space<vmem>>, vector<4x128xf32>
    %cst_9 = arith.constant dense<0.000000e+00> : vector<8x128xf32>
    %12 = tpu.matmul %10, %11, %cst_9 {dimension_numbers = #tpu.dot_dimension_numbers<[1], [0], [0], [1], [0, 0, 1, 1], [], []>, precision = #tpu.contract_precision<fp32>} : vector<8x4xf32>, vector<4x128xf32>, vector<8x128xf32> -> vector<8x128xf32>
    %13 = arith.mulf %0, %12 : vector<8x128xf32>
    %c0_10 = arith.constant 0 : index
    %c0_11 = arith.constant 0 : index
    %14 = vector.load %arg4[%c0_10, %c0_11] : memref<8x128xf32, #tpu.memory_space<vmem>>, vector<8x128xf32>
    tpu.vector_store %arg4[%c0_10, %c0_11], %13 {strides = array<i32>} : memref<8x128xf32, #tpu.memory_space<vmem>>, vector<8x128xf32>,
    return
  }
  func.func @transform_0(%arg0: i32) -> (i32, i32) {
    %c0_i32 = arith.constant 0 : i32
    %c0_i32_0 = arith.constant 0 : i32
    return %arg0, %c0_i32 : i32, i32
  }
  func.func @transform_1(%arg0: i32) -> (i32, i32) {
    %c0_i32 = arith.constant 0 : i32
    %c0_i32_0 = arith.constant 0 : i32
    %c0_i32_1 = arith.constant 0 : i32
    return %c0_i32, %c0_i32_0 : i32, i32
  }
  func.func @transform_2(%arg0: i32) -> (i32, i32) {
    %c0_i32 = arith.constant 0 : i32
    %c0_i32_0 = arith.constant 0 : i32
    %c0_i32_1 = arith.constant 0 : i32
    return %c0_i32, %c0_i32_0 : i32, i32
  }
  func.func @transform_3(%arg0: i32) -> (i32, i32) {
    %c0_i32 = arith.constant 0 : i32
    %c0_i32_0 = arith.constant 0 : i32
    return %arg0, %c0_i32 : i32, i32
  }
  func.func @transform_4(%arg0: i32) -> (i32, i32) {
    %c0_i32 = arith.constant 0 : i32
    %c0_i32_0 = arith.constant 0 : i32
    return %arg0, %c0_i32 : i32, i32
  }
}

</mosaic_0001>

<bundles_post_ra>
// kernel: _score_and_scale_impl.1
= control target key start
LH: loop header
LB: loop body
LE: loop exit
PB: predicated region body
PF: predicated region fallthrough
CT: control target
= control target key end

     0   :  { %v1671_v0 = vmov 0.0|0.0   ;;  %vm1672_vm0 = vmmov 0   ;;  %v1673_v8 = vmov 0.0   ;;  %vm687_vm1 = vcmask 1043456   ;;  %s2029_s1 = inlined_call_operand.vmem [shape: f32[128,4], index: 1, kind: input, shape index: {}]   ;;  %s2030_s0 = inlined_call_operand.vmem [shape: f32[8,128], index: 0, kind: input, shape index: {}]   ;;  %s2031_s2 = inlined_call_operand.vmem [shape: f32[4,128], index: 2, kind: input, shape index: {}]   ;;  %s2032_s4 = inlined_call_operand.vmem [shape: f32[8,4], index: 4, kind: output, shape index: {1}]   ;;  %s2033_s3 = inlined_call_operand.vmem [shape: f32[8,128], index: 3, kind: output, shape index: {0}]  }
   0x1   :  { %1502 = vmatprep.subr.bf16.mxu1 %v1671_v0  ;;  %1574 = vmatprep.subr.bf16.mxu0 %v1671_v0  ;;  %v17_v1 = vld [vmem:[%s2029_s1] sm:$0xff]  ;;  %v18_v2 = vld [vmem:[%s2029_s1 + $0x8] sm:$0xff]  ;;  %v19_v3 = vld [vmem:[%s2029_s1 + $0x10] sm:$0xff]  ;;  %vm680_vm2 = vcmask 31744  }
   0x2   :  { %v34_v4 = vand.u32 4294901760, %v17_v1  ;;  %v37_v5 = vand.u32 4294901760, %v18_v2  ;;  %v20_v6 = vld [vmem:[%s2029_s1 + $0x18] sm:$0xff]  ;;  %v40_v7 = vand.u32 4294901760, %v19_v3  ;;  %1294 = vmatprep.mubr.msk.f32.mxu1 %vm1672_vm0, %v1673_v8  ;;  %1399 = vmatprep.mubr.msk.f32.mxu0 %vm1672_vm0, %v1673_v8  ;;  %v21_v10 = vld [vmem:[%s2029_s1 + $0x20] sm:$0xff]  ;;  %v22_v11 = vld [vmem:[%s2029_s1 + $0x28] sm:$0xff] }
   0x3   :  { %v43_v9 = vand.u32 4294901760, %v20_v6  ;;  %v46_v14 = vand.u32 4294901760, %v21_v10  ;;  %v49_v15 = vand.u32 4294901760, %v22_v11  ;;  %v23_v16 = vld [vmem:[%s2029_s1 + $0x30] sm:$0xff]  ;;  %v24_v17 = vld [vmem:[%s2029_s1 + $0x38] sm:$0xff]  ;;  %v1746_v21 = vld [vmem:[%s2029_s1 + $0x40] sm:$0xff] }
   0x4   :  { %v1723_v12 = vpack.c.bf16 %v37_v5, %v34_v4  ;;  %v52_v19 = vand.u32 4294901760, %v23_v16  ;;  %v55_v20 = vand.u32 4294901760, %v24_v17  ;;  %v1751_v22 = vld [vmem:[%s2029_s1 + $0x48] sm:$0xff]  ;;  %v58_v24 = vand.u32 4294901760, %v1746_v21  ;;  %v1762_v26 = vld [vmem:[%s2030_s0] sm:$0xff]  ;;  %v1769_v27 = vld [vmem:[%s2029_s1 + $0x50] sm:$0xff] }
   0x5   :  { %v1727_v13 = vpack.c.bf16 %v43_v9, %v40_v7  ;;  %v1739_v18 = vpack.c.bf16 %v49_v15, %v46_v14  ;;  %v61_v25 = vand.u32 4294901760, %v1751_v22  ;;  %v1774_v28 = vld [vmem:[%s2029_s1 + $0x58] sm:$0xff]  ;;  %v1776_v29 = vsub.f32 %v17_v1, %v34_v4  ;;  %v1792_v35 = vld [vmem:[%s2029_s1 + $0x60] sm:$0xff]  ;;  %v1799_v36 = vld [vmem:[%s2029_s1 + $0x68] sm:$0xff] }
   0x6   :  { %1504 = vmatpush3.bf16.msra.mxu1 %v1723_v12  ;;  %1576 = vmatpush3.bf16.msra.mxu0 %v1723_v12  ;;  %v1755_v23 = vpack.c.bf16 %v55_v20, %v52_v19  ;;  %v1779_v30 = vand.u32 4294901760, %v1762_v26  ;;  %v1781_v31 = vsub.f32 %v18_v2, %v37_v5  ;;  %v64_v33 = vand.u32 4294901760, %v1769_v27  ;;  %v1822_v43 = vld [vmem:[%s2029_s1 + $0x70] sm:$0xff]  ;;  %v1827_v44 = vld [vmem:[%s2029_s1 + $0x78] sm:$0xff] }
   0x7   :  { %1505 = vmatprep.subr.bf16.mxu1 %v1671_v0  ;;  %1577 = vmatprep.subr.bf16.mxu0 %v1671_v0  ;;  %v1785_v32 = vpack.c.bf16 %v61_v25, %v58_v24  ;;  %v67_v34 = vand.u32 4294901760, %v1774_v28  ;;  %v1801_v37 = vsub.f32 %v19_v3, %v40_v7  ;;  %v1803_v38 = vsub.f32 %v20_v6, %v43_v9 }
   0x8   :  { %v70_v39 = vand.u32 4294901760, %v1792_v35  ;;  %v1808_v40 = vsub.f32 %v1762_v26, %v1779_v30  ;;  %v73_v42 = vand.u32 4294901760, %v1799_v36  ;;  %v127_v45 = vand.u32 4294901760, %v1776_v29 }
   0x9   :  { %v1816_v41 = vpack.c.bf16 %v67_v34, %v64_v33  ;;  %v134_v46 = vand.u32 4294901760, %v1781_v31  ;;  %v1833_v47 = vsub.f32 %v21_v10, %v46_v14  ;;  %v1835_v48 = vsub.f32 %v22_v11, %v49_v15 }
   0xa   :  { %1507 = vmatpush3.bf16.msra.mxu1 %v1727_v13  ;;  %1579 = vmatpush3.bf16.msra.mxu0 %v1727_v13  ;;  %v76_v49 = vand.u32 4294901760, %v1822_v43  ;;  %v79_v50 = vand.u32 4294901760, %v1827_v44  ;;  %v116_v51 = vand.u32 4294901760, %v1808_v40  ;;  %v141_v52 = vand.u32 4294901760, %v1801_v37 }
   0xb   :  { %1508 = vmatprep.subr.bf16.mxu1 %v1671_v0  ;;  %1580 = vmatprep.subr.bf16.mxu0 %v1671_v0  ;;  %v1847_v53 = vpack.c.bf16 %v73_v42, %v70_v39  ;;  %v128_v54 = vsub.f32 %v1776_v29, %v127_v45  ;;  %v135_v55 = vsub.f32 %v1781_v31, %v134_v46  ;;  %v148_v56 = vand.u32 4294901760, %v1803_v38 }
   0xc   :  { %v1854_v57 = vsub.f32 %v23_v16, %v52_v19  ;;  %v1856_v58 = vsub.f32 %v24_v17, %v55_v20  ;;  %v117_v59 = vsub.f32 %v1808_v40, %v116_v51  ;;  %v142_v60 = vsub.f32 %v1801_v37, %v141_v52 }
   0xd   :  { %v155_v61 = vand.u32 4294901760, %v1833_v47  ;;  %v162_v62 = vand.u32 4294901760, %v1835_v48  ;;  %v1868_v63 = vpack.c.bf16 %v79_v50, %v76_v49  ;;  %v129_v1 = vand.u32 4294901760, %v128_v54 }
   0xe   :  { %1510 = vmatpush3.bf16.msra.mxu1 %v1739_v18  ;;  %1582 = vmatpush3.bf16.msra.mxu0 %v1739_v18  ;;  %v136_v2 = vand.u32 4294901760, %v135_v55  ;;  %v149_v3 = vsub.f32 %v1803_v38, %v148_v56  ;;  %v1874_v4 = vsub.f32 %v1746_v21, %v58_v24  ;;  %v1877_v5 = vsub.f32 %v1751_v22, %v61_v25 }
   0xf   :  { %1511 = vmatprep.subr.bf16.mxu1 %v1671_v0  ;;  %1583 = vmatprep.subr.bf16.mxu0 %v1671_v0  ;;  %v1599_v6 = vpack.c.bf16 %v134_v46, %v127_v45  ;;  %v118_v7 = vand.u32 4294901760, %v117_v59  ;;  %v143_v9 = vand.u32 4294901760, %v142_v60  ;;  %v156_v10 = vsub.f32 %v1833_v47, %v155_v61 }
  0x10   :  { %v163_v11 = vsub.f32 %v1835_v48, %v162_v62  ;;  %v1527_v14 = vpack.c.bf16 %v136_v2, %v129_v1  ;;  %v150_v15 = vand.u32 4294901760, %v149_v3  ;;  %v169_v16 = vand.u32 4294901760, %v1854_v57 }
  0x11   :  { %v176_v17 = vand.u32 4294901760, %v1856_v58  ;;  %v1890_v19 = vsub.f32 %v1769_v27, %v64_v33  ;;  %v1895_v20 = vsub.f32 %v1774_v28, %v67_v34  ;;  %v1602_v21 = vpack.c.bf16 %v148_v56, %v141_v52 }
  0x12   :  { %1513 = vmatpush3.bf16.msra.mxu1 %v1755_v23  ;;  %1585 = vmatpush3.bf16.msra.mxu0 %v1755_v23  ;;  %v157_v22 = vand.u32 4294901760, %v156_v10  ;;  %v164_v24 = vand.u32 4294901760, %v163_v11  ;;  %v183_v25 = vand.u32 4294901760, %v1874_v4  ;;  %v1530_v45 = vpack.c.bf16 %v150_v15, %v143_v9 }
  0x13   :  { %1514 = vmatprep.subr.bf16.mxu1 %v1671_v0  ;;  %1586 = vmatprep.subr.bf16.mxu0 %v1671_v0  ;;  %v170_v46 = vsub.f32 %v1854_v57, %v169_v16  ;;  %v177_v27 = vsub.f32 %v1856_v58, %v176_v17  ;;  %v190_v33 = vand.u32 4294901760, %v1877_v5  ;;  %v1906_v28 = vsub.f32 %v1792_v35, %v70_v39 }
  0x14   :  { %v1911_v34 = vsub.f32 %v1799_v36, %v73_v42  ;;  %v1605_v52 = vpack.c.bf16 %v162_v62, %v155_v61  ;;  %v184_v54 = vsub.f32 %v1874_v4, %v183_v25  ;;  %v197_v55 = vand.u32 4294901760, %v1890_v19 }
  0x15   :  { %v171_v35 = vand.u32 4294901760, %v170_v46  ;;  %v178_v39 = vand.u32 4294901760, %v177_v27  ;;  %v191_v56 = vsub.f32 %v1877_v5, %v190_v33  ;;  %v204_v36 = vand.u32 4294901760, %v1895_v20 }
  0x16   :  { %1516 = vmatpush3.bf16.msra.mxu1 %v1785_v32  ;;  %1588 = vmatpush3.bf16.msra.mxu0 %v1785_v32  ;;  %v1926_v42 = vsub.f32 %v1822_v43, %v76_v49  ;;  %v1931_v59 = vsub.f32 %v1827_v44, %v79_v50  ;;  %v1608_v60 = vpack.c.bf16 %v176_v17, %v169_v16  ;;  %v185_v61 = vand.u32 4294901760, %v184_v54 }
  0x17   :  { %1517 = vmatprep.subr.bf16.mxu1 %v1671_v0  ;;  %1589 = vmatprep.subr.bf16.mxu0 %v1671_v0  ;;  %v198_v62 = vsub.f32 %v1890_v19, %v197_v55  ;;  %v211_v1 = vand.u32 4294901760, %v1906_v28  ;;  %v1536_v2 = vpack.c.bf16 %v178_v39, %v171_v35  ;;  %v192_v3 = vand.u32 4294901760, %v191_v56 }
  0x18   :  { %v218_v43 = vand.u32 4294901760, %v1911_v34  ;;  %v1611_v44 = vpack.c.bf16 %v190_v33, %v183_v25  ;;  %v1614_v15 = vpack.c.bf16 %v204_v36, %v197_v55  ;;  %v1554_v54 = vpack.c.bf16 %v1803_v38, %v1801_v37 }
  0x19   :  { %v199_v49 = vand.u32 4294901760, %v198_v62  ;;  %v212_v50 = vsub.f32 %v1906_v28, %v211_v1  ;;  %v1539_v9 = vpack.c.bf16 %v192_v3, %v185_v61 }
  0x1a   :  { %1519 = vmatpush3.bf16.msra.mxu1 %v1816_v41  ;;  %1591 = vmatpush3.bf16.msra.mxu0 %v1816_v41  ;;  %v219_v11 = vsub.f32 %v1911_v34, %v218_v43 }
  0x1b   :  { %1520 = vmatprep.subr.bf16.mxu1 %v1671_v0  ;;  %1592 = vmatprep.subr.bf16.mxu0 %v1671_v0  ;;  %v213_v16 = vand.u32 4294901760, %v212_v50 }
  0x1e   :  { %1522 = vmatpush3.bf16.msra.mxu1 %v1847_v53  ;;  %1594 = vmatpush3.bf16.msra.mxu0 %v1847_v53 }
  0x1f   :  { %1523 = vmatprep.subr.bf16.mxu1 %v1671_v0  ;;  %1595 = vmatprep.subr.bf16.mxu0 %v1671_v0 }
  0x22   :  { %1525 = vmatpush3.bf16.msra.mxu1 %v1868_v63  ;;  %1597 = vmatpush3.bf16.msra.mxu0 %v1868_v63 }
  0x23   :  { %1526 = vmatprep.subr.bf16.mxu1 %v1671_v0  ;;  %1598 = vmatprep.subr.bf16.mxu0 %v1671_v0 }
  0x25   :  { %1295 = vmatmul.mubr.f32.vlgmr.msra.gmra.mrb[0].mxu1 %v118_v7  ;;  %1400 = vmatmul.mubr.f32.vlgmr.msra.gmra.mrb[0].mxu0 %v116_v51  ;;  %v1533_v51 = vpack.c.bf16 %v164_v24, %v157_v22  ;;  %v225_v7 = vand.u32 4294901760, %v1926_v42 }
  0x26   :  { %1528 = vmatpush3.bf16.msra.mxu1 %v1527_v14  ;;  %1600 = vmatpush3.bf16.msra.mxu0 %v1599_v6  ;;  %v205_v6 = vsub.f32 %v1895_v20, %v204_v36  ;;  %v232_v14 = vand.u32 4294901760, %v1931_v59 }
  0x27   :  { %1529 = vmatprep.subr.bf16.mxu1 %v1671_v0  ;;  %1601 = vmatprep.subr.bf16.mxu0 %v1671_v0  ;;  %v226_v22 = vsub.f32 %v1926_v42, %v225_v7 }
  0x28   :  { %1329 = vmatprep.mubr.msk.f32.mxu1 %vm1672_vm0, %v1673_v8  ;;  %1434 = vmatprep.mubr.msk.f32.mxu0 %vm1672_vm0, %v1673_v8  ;;  %v206_v10 = vand.u32 4294901760, %v205_v6  ;;  %v233_v24 = vsub.f32 %v1931_v59, %v232_v14 }
  0x29   :  { %v227_v46 = vand.u32 4294901760, %v226_v22 }
  0x2a   :  { %1531 = vmatpush3.bf16.msra.mxu1 %v1530_v45  ;;  %1603 = vmatpush3.bf16.msra.mxu0 %v1602_v21  ;;  %v1542_v17 = vpack.c.bf16 %v206_v10, %v199_v49  ;;  %v220_v21 = vand.u32 4294901760, %v219_v11  ;;  %v1617_v45 = vpack.c.bf16 %v218_v43, %v211_v1  ;;  %v234_v27 = vand.u32 4294901760, %v233_v24 }
  0x2b   :  { %1532 = vmatprep.subr.bf16.mxu1 %v1671_v0  ;;  %1604 = vmatprep.subr.bf16.mxu0 %v1671_v0 }
  0x2c   :  { %v1545_v25 = vpack.c.bf16 %v220_v21, %v213_v16  ;;  %v1548_v33 = vpack.c.bf16 %v234_v27, %v227_v46 }
  0x2e   :  { %1534 = vmatpush3.bf16.msra.mxu1 %v1533_v51  ;;  %1606 = vmatpush3.bf16.msra.mxu0 %v1605_v52  ;;  %v1620_v51 = vpack.c.bf16 %v232_v14, %v225_v7  ;;  %v1551_v52 = vpack.c.bf16 %v1781_v31, %v1776_v29  ;;  %v1557_v29 = vpack.c.bf16 %v1835_v48, %v1833_v47 }
  0x2f   :  { %1535 = vmatprep.subr.bf16.mxu1 %v1671_v0  ;;  %1607 = vmatprep.subr.bf16.mxu0 %v1671_v0  ;;  %v1572_v31 = vpack.c.bf16 %v1931_v59, %v1926_v42 }
  0x32   :  { %1537 = vmatpush3.bf16.msra.mxu1 %v1536_v2  ;;  %1609 = vmatpush3.bf16.msra.mxu0 %v1608_v60 }
  0x33   :  { %1538 = vmatprep.subr.bf16.mxu1 %v1671_v0  ;;  %1610 = vmatprep.subr.bf16.mxu0 %v1671_v0 }
  0x36   :  { %1540 = vmatpush3.bf16.msra.mxu1 %v1539_v9  ;;  %1612 = vmatpush3.bf16.msra.mxu0 %v1611_v44 }
  0x37   :  { %1541 = vmatprep.subr.bf16.mxu1 %v1671_v0  ;;  %1613 = vmatprep.subr.bf16.mxu0 %v1671_v0 }
  0x3a   :  { %1543 = vmatpush3.bf16.msra.mxu1 %v1542_v17  ;;  %1615 = vmatpush3.bf16.msra.mxu0 %v1614_v15 }
  0x3b   :  { %1544 = vmatprep.subr.bf16.mxu1 %v1671_v0  ;;  %1616 = vmatprep.subr.bf16.mxu0 %v1671_v0 }
  0x3e   :  { %1546 = vmatpush3.bf16.msra.mxu1 %v1545_v25  ;;  %1618 = vmatpush3.bf16.msra.mxu0 %v1617_v45 }
  0x3f   :  { %1547 = vmatprep.subr.bf16.mxu1 %v1671_v0  ;;  %1619 = vmatprep.subr.bf16.mxu0 %v1671_v0 }
  0x42   :  { %1549 = vmatpush3.bf16.msra.mxu1 %v1548_v33  ;;  %1621 = vmatpush3.bf16.msra.mxu0 %v1620_v51 }
  0x43   :  { %1550 = vmatprep.subr.bf16.mxu1 %v1671_v0  ;;  %1622 = vmatprep.subr.bf16.mxu0 %v1671_v0 }
  0x45   :  { %1330 = vmatmul.mubr.f32.vlgmr.msra.gmra.mrb[0].mxu1 %v1779_v30  ;;  %1435 = vmatmul.mubr.f32.vlgmr.msra.gmra.mrb[0].mxu0 %v1779_v30 }
  0x46   :  { %1552 = vmatpush3.bf16.msra.mxu1 %v1551_v52  ;;  %1624 = vmatpush3.bf16.msra.mxu0 %v1723_v12  ;;  %v1560_v12 = vpack.c.bf16 %v1856_v58, %v1854_v57 }
  0x47   :  { %1553 = vmatprep.subr.bf16.mxu1 %v1671_v0  ;;  %1625 = vmatprep.subr.bf16.mxu0 %v1671_v0 }
  0x48   :  { %1364 = vmatprep.mubr.msk.f32.mxu1 %vm1672_vm0, %v1673_v8  ;;  %1469 = vmatprep.mubr.msk.f32.mxu0 %vm1672_vm0, %v1673_v8 }
  0x4a   :  { %1555 = vmatpush3.bf16.msra.mxu1 %v1554_v54  ;;  %1627 = vmatpush3.bf16.msra.mxu0 %v1727_v13  ;;  %v1563_v13 = vpack.c.bf16 %v1877_v5, %v1874_v4 }
  0x4b   :  { %1556 = vmatprep.subr.bf16.mxu1 %v1671_v0  ;;  %1628 = vmatprep.subr.bf16.mxu0 %v1671_v0 }
  0x4e   :  { %1558 = vmatpush3.bf16.msra.mxu1 %v1557_v29  ;;  %1630 = vmatpush3.bf16.msra.mxu0 %v1739_v18  ;;  %v1566_v18 = vpack.c.bf16 %v1895_v20, %v1890_v19 }
  0x4f   :  { %1559 = vmatprep.subr.bf16.mxu1 %v1671_v0  ;;  %1631 = vmatprep.subr.bf16.mxu0 %v1671_v0 }
  0x52   :  { %1561 = vmatpush3.bf16.msra.mxu1 %v1560_v12  ;;  %1633 = vmatpush3.bf16.msra.mxu0 %v1755_v23  ;;  %v1569_v23 = vpack.c.bf16 %v1911_v34, %v1906_v28 }
  0x53   :  { %1562 = vmatprep.subr.bf16.mxu1 %v1671_v0  ;;  %1634 = vmatprep.subr.bf16.mxu0 %v1671_v0 }
  0x56   :  { %1564 = vmatpush3.bf16.msra.mxu1 %v1563_v13  ;;  %1636 = vmatpush3.bf16.msra.mxu0 %v1785_v32 }
  0x57   :  { %1565 = vmatprep.subr.bf16.mxu1 %v1671_v0  ;;  %1637 = vmatprep.subr.bf16.mxu0 %v1671_v0 }
  0x5a   :  { %1567 = vmatpush3.bf16.msra.mxu1 %v1566_v18  ;;  %1639 = vmatpush3.bf16.msra.mxu0 %v1816_v41 }
  0x5b   :  { %1568 = vmatprep.subr.bf16.mxu1 %v1671_v0  ;;  %1640 = vmatprep.subr.bf16.mxu0 %v1671_v0 }
  0x5e   :  { %1570 = vmatpush3.bf16.msra.mxu1 %v1569_v23  ;;  %1642 = vmatpush3.bf16.msra.mxu0 %v1847_v53 }
  0x5f   :  { %1571 = vmatprep.subr.bf16.mxu1 %v1671_v0  ;;  %1643 = vmatprep.subr.bf16.mxu0 %v1671_v0  ;;  %v683_v0 = vld [vmem:[%s2031_s2] sm:$0xf] }
  0x60   :  { %v689_v32 = vsel %vm687_vm1, %v683_v0, 0 }
  0x61   :  { %v692_v37 = vand.u32 4294901760, %v689_v32 }
  0x62   :  { %1573 = vmatpush3.bf16.msra.mxu1 %v1572_v31  ;;  %1645 = vmatpush3.bf16.msra.mxu0 %v1868_v63 }
  0x63   :  { %1487 = vmatprep.subr.mxu1 %v1673_v8  ;;  %1472 = vmatprep.subr.mxu0 %v1673_v8  ;;  %v769_v58 = vsub.f32 %v689_v32, %v692_v37 }
  0x65   :  { %1365 = vmatmul.mubr.f32.vlgmr.msra.gmra.mrb[0].mxu1 %v1808_v40  ;;  %1470 = vmatmul.mubr.f32.vlgmr.msra.gmra.mrb[0].mxu0 %v1779_v30  ;;  %v770_v19 = vand.u32 4294901760, %v769_v58 }
  0x66   :  { %1489 = vmatprep.mubr.msk.f32.mxu1 %vm1672_vm0, %v1673_v8  ;;  %1474 = vmatprep.mubr.msk.f32.mxu0 %vm1672_vm0, %v1673_v8 }
  0x67   :  { %1488 = vmatpush3.msra.mxu1 %v692_v37  ;;  %1473 = vmatpush3.msra.mxu0 %v692_v37  ;;  %v771_v34 = vsub.f32 %v769_v58, %v770_v19 }
  0x68   :  { %1477 = vmatprep.subr.mxu0 %v1673_v8  ;;  %1492 = vmatprep.subr.mxu1 %v1673_v8 }
  0x69   :  { %v772_v39 = vand.u32 4294901760, %v771_v34 }
 0x138   :  { %v375_v30 = vpop.f32.mrb[0].mxu1  ;;  %v670_v38 = vpop.f32.mrb[0].mxu0 }
 0x139   :  { %v1646_v40 = vadd.f32 %v670_v38, %v375_v30  ;;  %v1366_v41 = vpop.f32.mrb[1].mxu1  ;;  %v1471_v47 = vpop.f32.mrb[1].mxu0 }
 0x13b   :  { %v1147_v48 = vmul.f32 -1.442695, %v1646_v40 }
 0x13d   :  { %1667 = vpow2.f32 %v1147_v48 }
 0x147   :  { %v1668_v53 = vpop.eup %1667 }
 0x148   :  { %v677_v57 = vadd.f32 1.0, %v1668_v53 }
 0x14a   :  { %1669 = vrcp.f32 %v677_v57 }
 0x154   :  { %v1670_v63 = vpop.eup %1669 }
 0x155   :  { %681 = vst.msk [vmem:[%s2032_s4] sm:$0xff] %vm680_vm2, %v1670_v63  ;;  %v682_v4 = vmul.f32 2.0, %v1670_v63 }
 0x157   :  { %v685_v5 = vsel %vm680_vm2, %v682_v4, 0 }
 0x158   :  { %v757_v20 = vand.u32 4294901760, %v685_v5 }
 0x15a   :  { %v758_v28 = vsub.f32 %v685_v5, %v757_v20 }
 0x15c   :  { %v759_v55 = vand.u32 4294901760, %v758_v28 }
 0x15e   :  { %1490 = vmatmul.mubr.f32.vlgmr.msra.gmra.mrb[2].mxu1 %v759_v55  ;;  %v760_v35 = vsub.f32 %v758_v28, %v759_v55 }
 0x15f   :  { %1493 = vmatpush3.msra.mxu1 %v770_v19  ;;  %1494 = vmatprep.mubr.msk.f32.mxu1 %vm1672_vm0, %v1673_v8 }
 0x160   :  { %v761_v56 = vand.u32 4294901760, %v760_v35  ;;  %1497 = vmatprep.subr.mxu1 %v1673_v8 }
 0x162   :  { %1475 = vmatmul.mubr.f32.vlgmr.msra.gmra.mrb[2].mxu0 %v761_v56 }
 0x163   :  { %1478 = vmatpush3.msra.mxu0 %v772_v39  ;;  %1479 = vmatprep.mubr.msk.f32.mxu0 %vm1672_vm0, %v1673_v8 }
 0x164   :  { %1482 = vmatprep.subr.mxu0 %v1673_v8 }
 0x166   :  { %1495 = vmatmul.mubr.f32.vlgmr.msra.gmra.mrb[2].mxu1 %v757_v20 }
 0x167   :  { %1498 = vmatpush3.msra.mxu1 %v692_v37  ;;  %1499 = vmatprep.mubr.msk.f32.mxu1 %vm1672_vm0, %v1673_v8 }
 0x16a   :  { %1480 = vmatmul.mubr.f32.vlgmr.msra.gmra.mrb[2].mxu0 %v757_v20 }
 0x16b   :  { %1483 = vmatpush3.msra.mxu0 %v769_v58  ;;  %1484 = vmatprep.mubr.msk.f32.mxu0 %vm1672_vm0, %v1673_v8 }
 0x16e   :  { %1500 = vmatmul.mubr.f32.vlgmr.msra.gmra.mrb[2].mxu1 %v757_v20 }
 0x172   :  { %1485 = vmatmul.mubr.f32.vlgmr.msra.gmra.mrb[2].mxu0 %v758_v28 }
 0x241   :  { %v1133_v36 = vpop.f32.mrb[2].mxu1 }
 0x242   :  { %v1501_v42 = vpop.f32.mrb[3].mxu1 }
 0x245   :  { %v913_v59 = vpop.f32.mrb[2].mxu0 }
 0x246   :  { %v1647_v60 = vadd.f32 %v1133_v36, %v913_v59  ;;  %v1486_v61 = vpop.f32.mrb[3].mxu0 }
 0x248   :  { %v1137_v62 = vmul.f32 %v1647_v60, %v1762_v26 }
 0x24a   :  { %1138 = vst [vmem:[%s2033_s3] sm:$0xff] %v1137_v62 }

</bundles_post_ra>
